<compile_context>
chip_gen: v6e
topology: v6e:2x2x1
jax: 0.10.0
libtpu: 0.0.40
codegen_flags: <defaults>
</compile_context>

<pallas_src>
import jax
import jax.numpy as jnp
from jax import lax
from jax.experimental import pallas as pl
from jax.experimental.pallas import tpu as pltpu


def _critic_kernel(x_ref, w1_ref, b1_ref, w2_ref, b2_ref, wq_ref, bq_ref,
                   out_ref):
    # x:  [TB, S+A] bf16     w1: [S+A, F1] bf16    b1: [1, F1] f32
    # w2: [F1, F2]  bf16     b2: [1, F2]  f32
    # wq: [1, F2]   bf16 (row form)        bq: [1, 1] f32 scalar in SMEM
    # out: [1, TB] f32  (lane-dense: batch on the 128-lane axis)

    # fc1 (fused): concat([state, action]) @ W1 — one MXU pass, f32 accum.
    h1 = jnp.dot(x_ref[...], w1_ref[...], preferred_element_type=jnp.float32)
    h1 = jnp.maximum(h1 + b1_ref[...], 0.0)          # bias + ReLU in f32 (VPU)

    # fc2: bf16 MXU inputs, f32 accumulation, f32 bias/ReLU.
    h2 = jnp.dot(h1.astype(jnp.bfloat16), w2_ref[...],
                 preferred_element_type=jnp.float32)
    h2 = jnp.maximum(h2 + b2_ref[...], 0.0)

    # q layer: contract F2 of wq_row with F2 of h2 -> lane-dense [1, TB].
    q = lax.dot_general(wq_ref[...], h2.astype(jnp.bfloat16),
                        dimension_numbers=(((1,), (1,)), ((), ())),
                        preferred_element_type=jnp.float32)
    out_ref[...] = (q + bq_ref[0, 0]).astype(out_ref.dtype)


def _round_up(x, m):
    return ((x + m - 1) // m) * m


_MAX_TB = 2048   # per-tile batch rows; ~10 MiB working set, fits v7x's 64 MiB


def _choose_batch_tiling(batch):
    """Return (tile_rows, padded_batch).

    Small RL batches -> one full-batch block (block == full array dims, so the
    (8,128) divisibility rule does not apply).  Larger batches -> 128-multiple
    lane tiles and at least 2 grid steps (v7x megacore sharding), with the
    batch padded so the grid divides evenly (pad rows are sliced off)."""
    if batch < 256:
        return batch, batch
    tb = min(_MAX_TB, _round_up((batch + 1) // 2, 128))
    return tb, _round_up(batch, tb)


@jax.jit
def critic_forward(state, action, params):
    """Pallas-backed equivalent of CriticNetwork.forward(state, action) -> [B, 1]."""
    w1, b1, w2, b2, wq, bq = params

    B, S = state.shape
    A = action.shape[1]
    SA = S + A
    F1 = w1.shape[1]
    F2 = w2.shape[1]

    # Wrapper-side concat + bf16 cast: one packed matmul input tile.
    x = jnp.concatenate([state.astype(jnp.float32),
                         action.astype(jnp.float32)], axis=1)
    x = x.astype(jnp.bfloat16)

    tb, padded = _choose_batch_tiling(B)
    if padded != B:
        x = jnp.pad(x, ((0, padded - B), (0, 0)))
    grid = (padded // tb,)

    flops = 2 * B * (SA * F1 + F1 * F2 + F2)
    bytes_accessed = (2 * (B * SA + SA * F1 + F1 * F2 + F2)   # bf16 operands
                      + 4 * (F1 + F2 + 1 + B))                # f32 biases/out

    q_row = pl.pallas_call(
        _critic_kernel,
        out_shape=jax.ShapeDtypeStruct((1, padded), jnp.float32),
        grid=grid,
        in_specs=[
            pl.BlockSpec((tb, SA), lambda i: (i, 0)),            # x (packed)
            pl.BlockSpec((SA, F1), lambda i: (0, 0)),            # w1 (packed)
            pl.BlockSpec((1, F1), lambda i: (0, 0)),             # b1
            pl.BlockSpec((F1, F2), lambda i: (0, 0)),            # w2
            pl.BlockSpec((1, F2), lambda i: (0, 0)),             # b2
            pl.BlockSpec((1, F2), lambda i: (0, 0)),             # wq (row form)
            pl.BlockSpec(memory_space=pltpu.MemorySpace.SMEM),   # bq scalar
        ],
        out_specs=pl.BlockSpec((1, tb), lambda i: (0, i)),       # lane-dense
        compiler_params=pltpu.CompilerParams(
            dimension_semantics=("parallel",),
            vmem_limit_bytes=40 * 1024 * 1024),
        cost_estimate=pl.CostEstimate(
            flops=flops, transcendentals=0, bytes_accessed=bytes_accessed),
    )(x, w1, b1, w2, b2, wq, bq)

    # Layout plumbing only: present the module's [B, 1] Q-value column.
    return q_row[:, :B].reshape(B, 1)


def init_critic_params(key, input_dim, n_actions, fc1_dims, fc2_dims):
    """nn.Linear-style U(-1/sqrt(fan_in), 1/sqrt(fan_in)) init.

    Matmul weights are stored in bf16 (fc1 packed as [S+A, F1]; q-layer weight
    in row form [1, F2]); biases stay f32 (bq as a [1, 1] SMEM scalar)."""
    def linear(k, fan_in, fan_out):
        kw, kb = jax.random.split(k)
        bound = 1.0 / jnp.sqrt(jnp.float32(fan_in))
        w = jax.random.uniform(kw, (fan_in, fan_out), jnp.float32, -bound, bound)
        b = jax.random.uniform(kb, (1, fan_out), jnp.float32, -bound, bound)
        return w, b

    k1, k2, k3 = jax.random.split(key, 3)
    w1, b1 = linear(k1, input_dim + n_actions, fc1_dims)
    w2, b2 = linear(k2, fc1_dims, fc2_dims)
    wq_col, bq = linear(k3, fc2_dims, 1)
    return (w1.astype(jnp.bfloat16), b1,
            w2.astype(jnp.bfloat16), b2,
            wq_col.T.astype(jnp.bfloat16), bq.reshape(1, 1))


def critic_reference_f32(state, action, params):
    """Pure-JAX f32 reference mirroring the PyTorch forward (concat form)."""
    w1, b1, w2, b2, wq, bq = params
    x = jnp.concatenate([state, action], axis=1).astype(jnp.float32)
    h1 = jnp.maximum(x @ w1.astype(jnp.float32) + b1, 0.0)
    h2 = jnp.maximum(h1 @ w2.astype(jnp.float32) + b2, 0.0)
    return h2 @ wq.astype(jnp.float32).T + bq


def critic_reference_mixed(state, action, params):
    """Reference mirroring the kernel's bf16-in / f32-accumulate numerics."""
    w1, b1, w2, b2, wq, bq = params
    x = jnp.concatenate([state, action], axis=1).astype(jnp.bfloat16)
    h1 = jnp.maximum(
        jnp.dot(x, w1, preferred_element_type=jnp.float32) + b1, 0.0)
    h2 = jnp.maximum(
        jnp.dot(h1.astype(jnp.bfloat16), w2,
                preferred_element_type=jnp.float32) + b2, 0.0)
    q = jnp.dot(h2.astype(jnp.bfloat16), wq.T,
                preferred_element_type=jnp.float32)
    return q + bq


if __name__ == "__main__":
    # Small shapes consistent with the module: input_dims=[8], n_actions=4,
    # fc1_dims=fc2_dims=256 (module defaults, (8,128)-aligned), batch=2.
    B, S, A = 2, 8, 4
    FC1, FC2 = 256, 256

    key = jax.random.PRNGKey(0)
    k_state, k_action, k_params = jax.random.split(key, 3)

    state = jax.random.normal(k_state, (B, S), dtype=jnp.float32)
    action = jax.random.normal(k_action, (B, A), dtype=jnp.float32)
    params = init_critic_params(k_params, S, A, FC1, FC2)

    out = jax.block_until_ready(critic_forward(state, action, params))
    assert out.shape == (B, 1), out.shape

    # Tight check vs a reference with identical bf16-in/f32-accum numerics.
    ref_mixed = critic_reference_mixed(state, action, params)
    assert jnp.allclose(out, ref_mixed, atol=2e-3, rtol=2e-3), (out, ref_mixed)

    # Looser check vs the pure-f32 module semantics (bf16 rounding only).
    ref_f32 = critic_reference_f32(state, action, params)
    assert jnp.allclose(out, ref_f32, atol=5e-2, rtol=5e-2), (out, ref_f32)

    print("KERNEL_OK")
</pallas_src>

<mosaic_0001>
module attributes {stable_mosaic.version = 11 : i64} {
  func.func @_critic_kernel(%arg0: i32, %arg1: memref<2x12xbf16, #tpu.memory_space<vmem>>, %arg2: memref<12x256xbf16, #tpu.memory_space<vmem>>, %arg3: memref<1x256xf32, #tpu.memory_space<vmem>>, %arg4: memref<256x256xbf16, #tpu.memory_space<vmem>>, %arg5: memref<1x256xf32, #tpu.memory_space<vmem>>, %arg6: memref<1x256xbf16, #tpu.memory_space<vmem>>, %arg7: memref<1x1xf32, #tpu.memory_space<smem>>, %arg8: memref<1x2xf32, #tpu.memory_space<vmem>>) attributes {dimension_semantics = [#tpu.dimension_semantics<parallel>], iteration_bounds = array<i64: 1>, scalar_prefetch = 0 : i64, scratch_operands = 0 : i64, tpu.core_type = #tpu.core_type<tc>, window_params = [{transform_indices = @transform_0, window_bounds = array<i64: 2, 12>}, {pipeline_mode = #tpu.pipeline_mode<synchronous>, transform_indices = @transform_1, window_bounds = array<i64: 12, 256>}, {pipeline_mode = #tpu.pipeline_mode<synchronous>, transform_indices = @transform_2, window_bounds = array<i64: 1, 256>}, {pipeline_mode = #tpu.pipeline_mode<synchronous>, transform_indices = @transform_3, window_bounds = array<i64: 256, 256>}, {pipeline_mode = #tpu.pipeline_mode<synchronous>, transform_indices = @transform_4, window_bounds = array<i64: 1, 256>}, {pipeline_mode = #tpu.pipeline_mode<synchronous>, transform_indices = @transform_5, window_bounds = array<i64: 1, 256>}, {transform_indices = @transform_6, window_bounds = array<i64: 1, 1>}, {transform_indices = @transform_7, window_bounds = array<i64: 1, 2>}]} {
    %c0 = arith.constant 0 : index
    %c0_0 = arith.constant 0 : index
    %0 = vector.load %arg1[%c0, %c0_0] : memref<2x12xbf16, #tpu.memory_space<vmem>>, vector<2x12xbf16>
    %c0_1 = arith.constant 0 : index
    %c0_2 = arith.constant 0 : index
    %1 = vector.load %arg2[%c0_1, %c0_2] : memref<12x256xbf16, #tpu.memory_space<vmem>>, vector<12x256xbf16>
    %cst = arith.constant dense<0.000000e+00> : vector<2x256xf32>
    %2 = tpu.matmul %0, %1, %cst {dimension_numbers = #tpu.dot_dimension_numbers<[1], [0], [0], [1], [0, 0, 1, 1], [], []>} : vector<2x12xbf16>, vector<12x256xbf16>, vector<2x256xf32> -> vector<2x256xf32>
    %c0_3 = arith.constant 0 : index
    %c0_4 = arith.constant 0 : index
    %3 = vector.load %arg3[%c0_3, %c0_4] : memref<1x256xf32, #tpu.memory_space<vmem>>, vector<1x256xf32>
    %4 = vector.broadcast %3 : vector<1x256xf32> to vector<2x256xf32>
    %5 = arith.addf %2, %4 : vector<2x256xf32>
    %cst_5 = arith.constant 0.000000e+00 : f32
    %6 = vector.broadcast %cst_5 : f32 to vector<2x256xf32>
    %7 = arith.maximumf %5, %6 : vector<2x256xf32>
    %8 = arith.truncf %7 : vector<2x256xf32> to vector<2x256xbf16>
    %c0_6 = arith.constant 0 : index
    %c0_7 = arith.constant 0 : index
    %9 = vector.load %arg4[%c0_6, %c0_7] : memref<256x256xbf16, #tpu.memory_space<vmem>>, vector<256x256xbf16>
    %cst_8 = arith.constant dense<0.000000e+00> : vector<2x256xf32>
    %10 = tpu.matmul %8, %9, %cst_8 {dimension_numbers = #tpu.dot_dimension_numbers<[1], [0], [0], [1], [0, 0, 1, 1], [], []>} : vector<2x256xbf16>, vector<256x256xbf16>, vector<2x256xf32> -> vector<2x256xf32>
    %c0_9 = arith.constant 0 : index
    %c0_10 = arith.constant 0 : index
    %11 = vector.load %arg5[%c0_9, %c0_10] : memref<1x256xf32, #tpu.memory_space<vmem>>, vector<1x256xf32>
    %12 = vector.broadcast %11 : vector<1x256xf32> to vector<2x256xf32>
    %13 = arith.addf %10, %12 : vector<2x256xf32>
    %cst_11 = arith.constant 0.000000e+00 : f32
    %14 = vector.broadcast %cst_11 : f32 to vector<2x256xf32>
    %15 = arith.maximumf %13, %14 : vector<2x256xf32>
    %c0_12 = arith.constant 0 : index
    %c0_13 = arith.constant 0 : index
    %16 = vector.load %arg6[%c0_12, %c0_13] : memref<1x256xbf16, #tpu.memory_space<vmem>>, vector<1x256xbf16>
    %17 = arith.truncf %15 : vector<2x256xf32> to vector<2x256xbf16>
    %cst_14 = arith.constant dense<0.000000e+00> : vector<1x2xf32>
    %18 = tpu.matmul %16, %17, %cst_14 {dimension_numbers = #tpu.dot_dimension_numbers<[1], [1], [0], [0], [0, 0, 1, 0], [], []>} : vector<1x256xbf16>, vector<2x256xbf16>, vector<1x2xf32> -> vector<1x2xf32>
    %c0_15 = arith.constant 0 : index
    %c0_16 = arith.constant 0 : index
    %19 = memref.load %arg7[%c0_15, %c0_16] : memref<1x1xf32, #tpu.memory_space<smem>>
    %20 = vector.broadcast %19 : f32 to vector<1x2xf32>
    %21 = arith.addf %18, %20 : vector<1x2xf32>
    %c0_17 = arith.constant 0 : index
    %c0_18 = arith.constant 0 : index
    %22 = vector.load %arg8[%c0_17, %c0_18] : memref<1x2xf32, #tpu.memory_space<vmem>>, vector<1x2xf32>
    tpu.vector_store %arg8[%c0_17, %c0_18], %21 {strides = array<i32>} : memref<1x2xf32, #tpu.memory_space<vmem>>, vector<1x2xf32>,
    return
  }
  func.func @transform_0(%arg0: i32) -> (i32, i32) {
    %c0_i32 = arith.constant 0 : i32
    %c0_i32_0 = arith.constant 0 : i32
    return %arg0, %c0_i32 : i32, i32
  }
  func.func @transform_1(%arg0: i32) -> (i32, i32) {
    %c0_i32 = arith.constant 0 : i32
    %c0_i32_0 = arith.constant 0 : i32
    %c0_i32_1 = arith.constant 0 : i32
    return %c0_i32, %c0_i32_0 : i32, i32
  }
  func.func @transform_2(%arg0: i32) -> (i32, i32) {
    %c0_i32 = arith.constant 0 : i32
    %c0_i32_0 = arith.constant 0 : i32
    %c0_i32_1 = arith.constant 0 : i32
    return %c0_i32, %c0_i32_0 : i32, i32
  }
  func.func @transform_3(%arg0: i32) -> (i32, i32) {
    %c0_i32 = arith.constant 0 : i32
    %c0_i32_0 = arith.constant 0 : i32
    %c0_i32_1 = arith.constant 0 : i32
    return %c0_i32, %c0_i32_0 : i32, i32
  }
  func.func @transform_4(%arg0: i32) -> (i32, i32) {
    %c0_i32 = arith.constant 0 : i32
    %c0_i32_0 = arith.constant 0 : i32
    %c0_i32_1 = arith.constant 0 : i32
    return %c0_i32, %c0_i32_0 : i32, i32
  }
  func.func @transform_5(%arg0: i32) -> (i32, i32) {
    %c0_i32 = arith.constant 0 : i32
    %c0_i32_0 = arith.constant 0 : i32
    %c0_i32_1 = arith.constant 0 : i32
    return %c0_i32, %c0_i32_0 : i32, i32
  }
  func.func @transform_6(%arg0: i32) -> (i32, i32) {
    %c0_i32 = arith.constant 0 : i32
    %c0_i32_0 = arith.constant 0 : i32
    %c0_i32_1 = arith.constant 0 : i32
    return %c0_i32, %c0_i32_0 : i32, i32
  }
  func.func @transform_7(%arg0: i32) -> (i32, i32) {
    %c0_i32 = arith.constant 0 : i32
    %c0_i32_0 = arith.constant 0 : i32
    return %c0_i32, %arg0 : i32, i32
  }
}

</mosaic_0001>

<bundles_post_ra>
// kernel: critic_forward.1
= control target key start
LH: loop header
LB: loop body
LE: loop exit
PB: predicated region body
PF: predicated region fallthrough
CT: control target
= control target key end

     0   :  { %13 = vsyncpa [#allocation4], 0  ;;  %s737_s0 = inlined_call_operand.vmem [shape: bf16[2,12], index: 0, kind: input, shape index: {}]   ;;  %s738_s1 = inlined_call_operand.vmem [shape: bf16[12,256], index: 1, kind: input, shape index: {}]   ;;  %s739_s2 = inlined_call_operand.vmem [shape: f32[1,256], index: 2, kind: input, shape index: {}]   ;;  %s740_s3 = inlined_call_operand.hbm [shape: bf16[256,256], index: 3, kind: input, shape index: {}]   ;;  %s741_s4 = inlined_call_operand.hbm [shape: f32[1,256], index: 4, kind: input, shape index: {}]   ;;  %s742_s5 = inlined_call_operand.hbm [shape: bf16[1,256], index: 5, kind: input, shape index: {}]   ;;  %s743_s6 = inlined_call_operand.<no memory space> [shape: f32[1,1], index: 6, kind: input, shape index: {}]   ;;  %s744_s7 = inlined_call_operand.hbm [shape: f32[1,2], index: 7, kind: output, shape index: {}]  }
   0x1   :  { %14 = vsyncpa [#allocation7], 0 }
   0x2   :  { %15 = vsyncpa [#allocation5], 0  ;;  %s662_s24 = smov [#allocation6]   ;;  %s663_s26 = smov [#allocation3]  }
   0x3   :  { %s40_s25 = sshll.u32 %s662_s24, 4  ;;  %s27_s27 = sshll.u32 %s663_s26, 4  ;;  %s41_s25 = int_to_ptr.vmem [resolvable:$true] %s40_s25  ;;  %s28_s27 = int_to_ptr.vmem [resolvable:$true] %s27_s27 }
   0x4   :  { %s584_s28 = scalar_lea.vmem %s41_s25, 32  ;;  %p589_p1 = scmp.lt.s32.totalorder %s41_s25, %s41_s25 }
   0x5   :  { %p585_p0 = scmp.ne.s32.totalorder %s41_s25, %s584_s28  ;;  %p590_p2 = scmp.lt.s32.totalorder %s584_s28, %s584_s28 }
   0x7   :  { %p591_p3 = por %p590_p2, %p589_p1 }
   0x9   :  { %p592_p4 = pnand %p591_p3, %p585_p0 }
   0xb   :  { %595 = shalt.err (!%p592_p4)
}
   0xc   :  { %43 = dma.hbm_to_vmem [thread:$0]  %s741_s4, 32, %s41_s25, [#allocation7]  }
   0xd   :  { %s604_s8 = scalar_lea.vmem %s28_s27, 4096  ;;  %p609_p6 = scmp.lt.s32.totalorder %s28_s27, %s28_s27 }
   0xe   :  { %p605_p5 = scmp.ne.s32.totalorder %s28_s27, %s604_s8  ;;  %p610_p7 = scmp.lt.s32.totalorder %s604_s8, %s604_s8 }
  0x10   :  { %p611_p8 = por %p610_p7, %p609_p6 }
  0x12   :  { %p612_p9 = pnand %p611_p8, %p605_p5 }
  0x14   :  { %615 = shalt.err (!%p612_p9)
}
  0x15   :  { %s664_s9 = smov 128   ;;  %s665_s10 = smov 8  }
  0x16   :  { %33 = dma.hbm_to_vmem [thread:$0]  %s740_s3, 4096, %s28_s27, [#allocation4], %s664_s9, %s664_s9, %s665_s10  }
  0x17   :  { %s666_s13 = smov [#allocation8]  }
  0x18   :  { %s50_s14 = sshll.u32 %s666_s13, 4  ;;  %s51_s14 = int_to_ptr.vmem [resolvable:$true] %s50_s14 }
  0x19   :  { %s624_s15 = scalar_lea.vmem %s51_s14, 32  ;;  %p629_p11 = scmp.lt.s32.totalorder %s51_s14, %s51_s14 }
  0x1a   :  { %p625_p10 = scmp.ne.s32.totalorder %s51_s14, %s624_s15  ;;  %p630_p12 = scmp.lt.s32.totalorder %s624_s15, %s624_s15 }
  0x1c   :  { %p631_p13 = por %p630_p12, %p629_p11 }
  0x1e   :  { %p632_p0 = pnand %p631_p13, %p625_p10 }
  0x20   :  { %635 = shalt.err (!%p632_p0)
}
  0x21   :  { %53 = dma.hbm_to_vmem [thread:$0]  %s742_s5, 32, %s51_s14, [#allocation7]  }
  0x22   :  { %656 = dma.done.wait [#allocation4], 4096  }
  0x23   :  { %657 = vsyncadd [#allocation4], 4294963200 }
  0x24   :  { %658 = dma.done.wait [#allocation7], 64  }
  0x25   :  { %659 = vsyncadd [#allocation7], 4294967232  ;;  %v667_v0 = vmov 0   ;;  %vm93_vm0 = vcmask 1045504   ;;  %v528_v3 = vld [vmem:[#allocation3 + $0x74] ss:$8 sps:$4 sm:$0xff]   ;;  %v71_v37 = vlaneseq }
  0x26   :  { %132 = vmatprep.mubr.bf16.mxu0 %v667_v0  ;;  %v525_v1 = vld [vmem:[%s738_s1 + $0x4] ss:$8 sps:$4 sm:$0x3f]   ;;  %v527_v2 = vld [vmem:[%s738_s1] ss:$8 sps:$4 sm:$0x3f]   ;;  %349 = vmatprep.subr.bf16.mxu1 %v528_v3 }
  0x27   :  { %482 = vmatprep.subr.msk.bf16.mxu0 %vm93_vm0, %v525_v1  ;;  %v530_v4 = vld [vmem:[#allocation3 + $0x70] ss:$8 sps:$4 sm:$0xff]   ;;  %v95_v5 = vsel %vm93_vm0, %v527_v2, 0  ;;  %v531_v6 = vld [vmem:[#allocation3 + $0x64] ss:$8 sps:$4 sm:$0xff]   ;;  %vm89_vm1 = vcmask 97280  }
  0x28   :  { %115 = vmatpush1.bf16.msra.mxu0 %v95_v5  ;;  %v66_v7 = vld [vmem:[%s737_s0] sm:$0x1]  ;;  %350 = vmatpush1.bf16.msra.mxu1 %v530_v4  ;;  %v534_v9 = vld [vmem:[#allocation3 + $0x54] ss:$8 sps:$4 sm:$0xff]   ;;  %v536_v10 = vld [vmem:[#allocation3 + $0x50] ss:$8 sps:$4 sm:$0xff]  }
  0x29   :  { %v533_v8 = vld [vmem:[#allocation3 + $0x60] ss:$8 sps:$4 sm:$0xff]   ;;  %351 = vmatprep.subr.bf16.mxu1 %v531_v6  ;;  %v537_v11 = vld [vmem:[#allocation3 + $0x44] ss:$8 sps:$4 sm:$0xff]   ;;  %v540_v13 = vld [vmem:[#allocation3 + $0x34] ss:$8 sps:$4 sm:$0xff]  }
  0x2a   :  { %v539_v12 = vld [vmem:[#allocation3 + $0x40] ss:$8 sps:$4 sm:$0xff]   ;;  %v542_v14 = vld [vmem:[#allocation3 + $0x30] ss:$8 sps:$4 sm:$0xff]   ;;  %v543_v15 = vld [vmem:[#allocation3 + $0x24] ss:$8 sps:$4 sm:$0xff]  }
  0x2b   :  { %483 = vmatmul.mubr.msk.bf16.vlgmr.msra.gmra.mxu0 %vm89_vm1, %v66_v7  ;;  %v545_v16 = vld [vmem:[#allocation3 + $0x20] ss:$8 sps:$4 sm:$0xff]   ;;  %v546_v17 = vld [vmem:[#allocation3 + $0x14] ss:$8 sps:$4 sm:$0xff]   ;;  %v548_v18 = vld [vmem:[#allocation3 + $0x10] ss:$8 sps:$4 sm:$0xff]  }
  0x2c   :  { %352 = vmatpush1.bf16.msra.mxu1 %v533_v8  ;;  %v549_v19 = vld [vmem:[#allocation3 + $0x4] ss:$8 sps:$4 sm:$0xff]   ;;  %v551_v20 = vld [vmem:[#allocation3] ss:$8 sps:$4 sm:$0xff]   ;;  %v552_v21 = vld [vmem:[#allocation3 + $0xf4] ss:$8 sps:$4 sm:$0xff]  }
  0x2d   :  { %353 = vmatprep.subr.bf16.mxu1 %v534_v9  ;;  %v554_v22 = vld [vmem:[#allocation3 + $0xf0] ss:$8 sps:$4 sm:$0xff]   ;;  %v555_v23 = vld [vmem:[#allocation3 + $0xe4] ss:$8 sps:$4 sm:$0xff]   ;;  %v557_v24 = vld [vmem:[#allocation3 + $0xe0] ss:$8 sps:$4 sm:$0xff]  }
  0x2e   :  { %v558_v25 = vld [vmem:[#allocation3 + $0xd4] ss:$8 sps:$4 sm:$0xff]   ;;  %v560_v26 = vld [vmem:[#allocation3 + $0xd0] ss:$8 sps:$4 sm:$0xff]   ;;  %v561_v27 = vld [vmem:[#allocation3 + $0xc4] ss:$8 sps:$4 sm:$0xff]  }
  0x2f   :  { %v563_v28 = vld [vmem:[#allocation3 + $0xc0] ss:$8 sps:$4 sm:$0xff]   ;;  %v564_v29 = vld [vmem:[#allocation3 + $0xb4] ss:$8 sps:$4 sm:$0xff]   ;;  %v566_v30 = vld [vmem:[#allocation3 + $0xb0] ss:$8 sps:$4 sm:$0xff]  }
  0x30   :  { %354 = vmatpush1.bf16.msra.mxu1 %v536_v10  ;;  %v567_v31 = vld [vmem:[#allocation3 + $0xa4] ss:$8 sps:$4 sm:$0xff]   ;;  %v569_v32 = vld [vmem:[#allocation3 + $0xa0] ss:$8 sps:$4 sm:$0xff]   ;;  %v570_v33 = vld [vmem:[#allocation3 + $0x94] ss:$8 sps:$4 sm:$0xff]  }
  0x31   :  { %355 = vmatprep.subr.bf16.mxu1 %v537_v11  ;;  %v572_v34 = vld [vmem:[#allocation3 + $0x90] ss:$8 sps:$4 sm:$0xff]   ;;  %v573_v35 = vld [vmem:[#allocation3 + $0x84] ss:$8 sps:$4 sm:$0xff]   ;;  %v575_v36 = vld [vmem:[#allocation3 + $0x80] ss:$8 sps:$4 sm:$0xff]   ;;  %v396_v11 = vstv %s743_s6 }
  0x32   :  { %v72_v38 = vshrl.u32 %v71_v37, 7  ;;  %v69_v40 = vld [vmem:[%s739_s2] sm:$0x3]  ;;  %v668_v54 = vmov 1966171168   ;;  %s669_s22 = smov [#allocation9]  }
  0x33   :  { %v407_v55 = vunpack.c.l.s4 %v668_v54  ;;  %v516_v56 = vld.sshfl [vmem:[#allocation8] sm:$0x11 pattern:$0x75316420]  ;;  %v177_v62 = vld [vmem:[#allocation6] sm:$0x3] }
  0x34   :  { %356 = vmatpush1.bf16.msra.mxu1 %v539_v12  ;;  %v73_v39 = vsub.s32 0, %v72_v38  ;;  %v77_v41 = vsub.s32 1, %v72_v38  ;;  %v405_v58 = vcombine.high %v516_v56, %v516_v56  ;;  %s470_s23 = sshll.u32 %s669_s22, 4  ;;  %vm462_vm2 = vcmask 8192   ;;  %s471_s23 = int_to_ptr.vmem [resolvable:$true] %s470_s23 }
  0x35   :  { %357 = vmatprep.subr.bf16.mxu1 %v540_v13  ;;  %v408_v57 = vunpack.c.0.s8 %v407_v55  ;;  %s636_s24 = scalar_lea.vmem %s471_s23, 16  ;;  %s640_s25 = scalar_lea.vmem %s471_s23, 32 }
  0x36   :  { %v74_v42 = vrot.slane %v69_v40, %v73_v39  ;;  %v78_v43 = vrot.slane %v69_v40, %v77_v41  ;;  %v182_v63 = vrot.slane %v177_v62, %v73_v39  ;;  %v186_v0 = vrot.slane %v177_v62, %v77_v41  ;;  %p637_p1 = scmp.ne.s32.totalorder %s471_s23, %s636_s24  ;;  %p641_p2 = scmp.lt.s32.totalorder %s471_s23, %s471_s23 }
  0x37   :  { %v411_v59 = vsub.s32 %v408_v57, %v72_v38  ;;  %p642_p3 = scmp.lt.s32.totalorder %s640_s25, %s636_s24 }
  0x38   :  { %358 = vmatpush1.bf16.msra.mxu1 %v542_v14 }
  0x39   :  { %359 = vmatprep.subr.bf16.mxu1 %v543_v15  ;;  %v419_v60 = vrot.slane %v405_v58, %v411_v59  ;;  %v412_v61 = vrot.slane %v516_v56, %v411_v59  ;;  %p643_p4 = por %p642_p3, %p641_p2 }
  0x3b   :  { %454 = vmatprep.mubr.bf16.mxu0 %v419_v60  ;;  %p644_p5 = pnand %p643_p4, %p637_p1 }
  0x3c   :  { %360 = vmatpush1.bf16.msra.mxu1 %v545_v16 }
  0x3d   :  { %361 = vmatprep.subr.bf16.mxu1 %v546_v17 }
  0x40   :  { %362 = vmatpush1.bf16.msra.mxu1 %v548_v18 }
  0x41   :  { %363 = vmatprep.subr.bf16.mxu1 %v549_v19 }
  0x44   :  { %364 = vmatpush1.bf16.msra.mxu1 %v551_v20 }
  0x45   :  { %365 = vmatprep.subr.bf16.mxu1 %v552_v21 }
  0x48   :  { %366 = vmatpush2.bf16.msra.mxu1 %v554_v22 }
  0x49   :  { %367 = vmatprep.subr.bf16.mxu1 %v555_v23 }
  0x4c   :  { %368 = vmatpush2.bf16.msra.mxu1 %v557_v24 }
  0x4d   :  { %369 = vmatprep.subr.bf16.mxu1 %v558_v25 }
  0x50   :  { %370 = vmatpush2.bf16.msra.mxu1 %v560_v26 }
  0x51   :  { %371 = vmatprep.subr.bf16.mxu1 %v561_v27 }
  0x54   :  { %372 = vmatpush2.bf16.msra.mxu1 %v563_v28 }
  0x55   :  { %373 = vmatprep.subr.bf16.mxu1 %v564_v29 }
  0x58   :  { %374 = vmatpush2.bf16.msra.mxu1 %v566_v30 }
  0x59   :  { %375 = vmatprep.subr.bf16.mxu1 %v567_v31 }
  0x5c   :  { %376 = vmatpush2.bf16.msra.mxu1 %v569_v32 }
  0x5d   :  { %377 = vmatprep.subr.bf16.mxu1 %v570_v33 }
  0x60   :  { %378 = vmatpush2.bf16.msra.mxu1 %v572_v34 }
  0x61   :  { %379 = vmatprep.subr.bf16.mxu1 %v573_v35 }
  0x64   :  { %380 = vmatpush2.bf16.msra.mxu1 %v575_v36 }
  0xeb   :  { %v134_v44 = vpop.f32.mrf.mxu0 }
  0xec   :  { %v135_v45 = vadd.f32 %v134_v44, %v74_v42 }
  0xed   :  { %v136_v46 = vpop.f32.mrf.mxu0 }
  0xee   :  { %v137_v47 = vadd.f32 %v136_v46, %v78_v43  ;;  %v141_v48 = vmax.f32 %v135_v45, 0.0 }
  0xef   :  { %v138_v49 = vpop.f32.mrf.mxu0 }
  0xf0   :  { %v142_v50 = vmax.f32 %v137_v47, 0.0  ;;  %v143_v53 = vpack.c.bf16 %v141_v48, %v141_v48 }
  0xf1   :  { %v139_v51 = vpop.f32.mrf.mxu0 }
  0xf2   :  { %v144_v52 = vpack.c.bf16 %v142_v50, %v142_v50 }
  0xf4   :  { %381 = vmatprep.mubr.bf16.mxu1 %v144_v52 }
  0xf5   :  { %382 = vmatmul.mubr.bf16.vlgmr.msra.gmra.mxu1 %v143_v53 }
 0x1b5   :  { %v383_v1 = vpop.f32.mrf.mxu1 }
 0x1b6   :  { %v384_v2 = vadd.f32 %v383_v1, %v182_v63 }
 0x1b7   :  { %v385_v3 = vpop.f32.mrf.mxu1 }
 0x1b8   :  { %v386_v4 = vadd.f32 %v385_v3, %v186_v0  ;;  %v390_v5 = vmax.f32 %v384_v2, 0.0 }
 0x1b9   :  { %v387_v6 = vpop.f32.mrf.mxu1 }
 0x1ba   :  { %v391_v7 = vmax.f32 %v386_v4, 0.0  ;;  %v393_v10 = vpack.c.bf16 %v390_v5, %v390_v5 }
 0x1bb   :  { %v388_v8 = vpop.f32.mrf.mxu1 }
 0x1bc   :  { %v394_v9 = vpack.c.bf16 %v391_v7, %v391_v7 }
 0x1be   :  { %436 = vmatprep.subr.bf16.mxu0 %v394_v9 }
 0x1bf   :  { %437 = vmatpush1.bf16.xpose.msra.mxu0 %v393_v10 }
 0x1c6   :  { %455 = vmatmul.mubr.bf16.vlgmr.msra.gmra.mxu0 %v412_v61 }
 0x286   :  { %v456_v12 = vpop.f32.mrf.mxu0 }
 0x287   :  { %v457_v13 = vadd.f32 %v456_v12, %v396_v11 }
 0x288   :  { %v458_v14 = vpop.f32.mrf.mxu0 }
 0x289   :  { %463 = vst.msk [vmem:[#allocation9] sm:$0x1] %vm462_vm2, %v457_v13 }
 0x28a   :  { %v459_v15 = vpop.f32.mrf.mxu0 }
 0x28b   :  { %647 = shalt.err (!%p644_p5)
}
 0x28c   :  { %473 = dma.vmem_to_hbm [thread:$0]  %s471_s23, 16, %s744_s7, [#allocation5]   ;;  %v460_v16 = vpop.f32.mrf.mxu0 }
 0x28d   :  { %660 = dma.done.wait [#allocation5], 16  }
 0x28e   :  { %661 = vsyncadd [#allocation5], 4294967280 }
 0x28f   :  { %477 = vsyncpa [#allocation4], 1 }
 0x290   :  { %478 = vsyncpa [#allocation7], 1 }
 0x291   :  { %479 = vsyncpa [#allocation5], 1 }

</bundles_post_ra>
